<compile_context>
chip_gen: v7x
topology: tpu7x:2x2x1
jax: 0.10.0
libtpu: 0.0.40
codegen_flags: <defaults>
</compile_context>

<pallas_src>
import numpy as np
import jax
import jax.numpy as jnp
from jax.experimental import pallas as pl
from jax.experimental.pallas import tpu as pltpu

BASE = 10000


# ----------------------------------------------------------------------------
# Kernel
# ----------------------------------------------------------------------------
def rope_kernel(cos_ref, sin_a_ref, sin_b_ref, x_ref, o_ref):
    # cos_ref / sin_a_ref / sin_b_ref : (tile_s, H) f32, interleaved layout
    # x_ref / o_ref                   : (1, tile_s, H) in x dtype
    x = x_ref[0].astype(jnp.float32)                 # (tile_s, H)
    h = x.shape[-1]
    # nxt[:, i] = x[:, (i+1) % h] ; prv[:, i] = x[:, (i-1) % h]
    nxt = pltpu.roll(x, shift=h - 1, axis=1)
    prv = pltpu.roll(x, shift=1, axis=1)
    out = x * cos_ref[...] + nxt * sin_a_ref[...] + prv * sin_b_ref[...]
    o_ref[0] = out.astype(o_ref.dtype)


# ----------------------------------------------------------------------------
# Cache construction (host side, one time)
# ----------------------------------------------------------------------------
def make_rope_cache(hidden_dim: int, seq_len: int, dtype=jnp.float32):
    """Matches RotaryEncoding.__init__ (built in f64, cast for TPU).
    Returns the module-layout caches of shape (seq_len, hidden_dim // 2)."""
    assert hidden_dim % 2 == 0
    dim_idx = np.arange(0, hidden_dim, 2, dtype=np.float64)
    theta = BASE ** (-dim_idx / hidden_dim)
    base = theta[None, :] * np.arange(seq_len, dtype=np.float64)[:, None]
    cos_cached = jnp.asarray(np.cos(base), dtype=dtype)
    sin_cached = jnp.asarray(np.sin(base), dtype=dtype)
    return cos_cached, sin_cached


def prepare_rope_kernel_cache(cos_cached, sin_cached, seq_len=None):
    """One-time host-side (numpy) build of the interleaved, sign-folded,
    lane-masked caches consumed by the kernel: (cos_rep, sin_a, sin_b),
    each of shape (seq_len, hidden_dim), float32."""
    cos = np.asarray(cos_cached, dtype=np.float32)
    sin = np.asarray(sin_cached, dtype=np.float32)
    if seq_len is not None:
        cos = cos[:seq_len]
        sin = sin[:seq_len]
    s, hh = cos.shape
    h = 2 * hh
    cos_rep = np.repeat(cos, 2, axis=-1)                       # (s, h)
    sin_a = np.zeros((s, h), dtype=np.float32)
    sin_a[:, 0::2] = -sin                                      # even lanes: -sin
    sin_b = np.zeros((s, h), dtype=np.float32)
    sin_b[:, 1::2] = sin                                       # odd lanes:  +sin
    return jnp.asarray(cos_rep), jnp.asarray(sin_a), jnp.asarray(sin_b)


# ----------------------------------------------------------------------------
# Tiling / VMEM sizing helpers
# ----------------------------------------------------------------------------
def _default_vmem_limit_bytes():
    """~48 MiB on v7x (64 MiB physical), up to 96 MiB on v5e/v6e (128 MiB)."""
    try:
        cap = int(pltpu.get_tpu_info().vmem_capacity_bytes)
    except Exception:
        cap = 64 * 1024 * 1024
    return int(min(96 * 1024 * 1024, (cap * 3) // 4))


def _pick_seq_tile(S, H, x_bytes, row_mult, vmem_budget_bytes, target_block_bytes):
    """Largest sublane-aligned seq tile whose double-buffered per-step VMEM
    footprint (x + out blocks in x dtype, 3 f32 cache blocks) fits the budget,
    targeting ~target_block_bytes of activation payload per block."""
    bytes_per_row = 2 * (2 * H * x_bytes + 3 * H * 4)
    max_rows_budget = max(row_mult, vmem_budget_bytes // bytes_per_row)
    max_rows_target = max(row_mult, target_block_bytes // max(H * x_bytes, 1))
    s_pad = pl.cdiv(S, row_mult) * row_mult
    ts = min(s_pad, max_rows_budget, max_rows_target)
    ts = max(row_mult, (ts // row_mult) * row_mult)
    return int(ts)


# ----------------------------------------------------------------------------
# Wrapper
# ----------------------------------------------------------------------------
def rotary_encoding(cos_cached, sin_cached, x, *, kernel_cache=None,
                    target_block_bytes=4 * 1024 * 1024, donate_x=False):
    """Pallas implementation of rotary_encoding_forward(cos, sin, x).

    x: (B, S, H) with H even (lane-dense, i.e. H % 128 == 0, is fastest).
    kernel_cache: optional (cos_rep, sin_a, sin_b) from prepare_rope_kernel_cache
                  (built once per model); otherwise derived here (tiny ops).
    donate_x: alias the output onto x's HBM buffer (in-place RoPE on q/k).
    """
    B, S, H = x.shape
    assert H % 2 == 0

    if kernel_cache is None:
        cdt = jnp.float32
        cos = cos_cached[:S].astype(cdt)                       # (S, H/2)
        sin = sin_cached[:S].astype(cdt)
        zeros = jnp.zeros_like(sin)
        cos_rep = jnp.repeat(cos, 2, axis=-1)                  # (S, H)
        sin_a = jnp.stack((-sin, zeros), axis=-1).reshape(S, H)
        sin_b = jnp.stack((zeros, sin), axis=-1).reshape(S, H)
    else:
        cos_rep, sin_a, sin_b = kernel_cache
    assert cos_rep.shape[-1] == H and cos_rep.shape[-2] >= S
    assert sin_a.shape == cos_rep.shape and sin_b.shape == cos_rep.shape

    # Sublane packing multiple for the activation dtype (f32:8, bf16:16, int8:32).
    itemsize = jnp.dtype(x.dtype).itemsize
    row_mult = 8 * max(1, 4 // max(itemsize, 1))

    vmem_limit = _default_vmem_limit_bytes()
    vmem_budget = int(vmem_limit * 0.8)                        # 20% headroom
    tile_s = _pick_seq_tile(S, H, itemsize, row_mult, vmem_budget, target_block_bytes)
    num_seq_tiles = pl.cdiv(S, tile_s)                         # partial tail is fine

    out = pl.pallas_call(
        rope_kernel,
        out_shape=jax.ShapeDtypeStruct((B, S, H), x.dtype),
        grid_spec=pltpu.PrefetchScalarGridSpec(
            num_scalar_prefetch=0,
            # seq tiles outer, batch inner: cos/sin block index is constant
            # across the inner batch loop -> Pallas skips their re-DMA.
            grid=(num_seq_tiles, B),
            in_specs=[
                pl.BlockSpec((tile_s, H), lambda j, b: (j, 0)),        # cos_rep
                pl.BlockSpec((tile_s, H), lambda j, b: (j, 0)),        # sin_a
                pl.BlockSpec((tile_s, H), lambda j, b: (j, 0)),        # sin_b
                pl.BlockSpec((1, tile_s, H), lambda j, b: (b, j, 0)),  # x
            ],
            out_specs=pl.BlockSpec((1, tile_s, H), lambda j, b: (b, j, 0)),
        ),
        compiler_params=pltpu.CompilerParams(
            dimension_semantics=("parallel", "parallel"),
            vmem_limit_bytes=vmem_limit,
        ),
        input_output_aliases=({3: 0} if donate_x else {}),
    )(cos_rep, sin_a, sin_b, x)
    return out


# ----------------------------------------------------------------------------
# Pure-JAX reference (port of rotary_encoding_forward) for validation
# ----------------------------------------------------------------------------
def rotary_encoding_ref(cos_cached, sin_cached, x):
    a = x[..., 0::2]
    b = x[..., 1::2]
    cos_r = cos_cached[: a.shape[-2], :]
    sin_r = sin_cached[: a.shape[-2], :]
    a2 = cos_r * a + sin_r * (-b)
    b2 = sin_r * a + cos_r * b
    return jnp.stack((a2, b2), axis=-1).reshape(x.shape)


if __name__ == "__main__":
    hidden_dim = 128        # lane-dense last dim (typical RoPE head_dim)
    seq_len_cache = 16      # module's seq_len (cache may exceed input seq)
    batch, seq = 2, 8

    cos_cached, sin_cached = make_rope_cache(hidden_dim, seq_len_cache)
    # One-time host-side build of the kernel-layout caches (reused every call).
    kernel_cache = prepare_rope_kernel_cache(cos_cached, sin_cached, seq_len_cache)

    key = jax.random.PRNGKey(0)
    x = jax.random.normal(key, (batch, seq, hidden_dim), dtype=jnp.float32)

    out = jax.block_until_ready(
        rotary_encoding(cos_cached, sin_cached, x, kernel_cache=kernel_cache))

    ref = rotary_encoding_ref(cos_cached, sin_cached, x)
    np.testing.assert_allclose(np.asarray(out), np.asarray(ref),
                               rtol=1e-6, atol=1e-6)

    print("KERNEL_OK")
</pallas_src>

<mosaic_0001>
module attributes {stable_mosaic.version = 11 : i64} {
  func.func @rope_kernel(%arg0: i32, %arg1: i32, %arg2: memref<8x128xf32, #tpu.memory_space<vmem>>, %arg3: memref<8x128xf32, #tpu.memory_space<vmem>>, %arg4: memref<8x128xf32, #tpu.memory_space<vmem>>, %arg5: memref<1x8x128xf32, #tpu.memory_space<vmem>>, %arg6: memref<1x8x128xf32, #tpu.memory_space<vmem>>) attributes {dimension_semantics = [#tpu.dimension_semantics<parallel>, #tpu.dimension_semantics<parallel>], iteration_bounds = array<i64: 1, 2>, scalar_prefetch = 0 : i64, scratch_operands = 0 : i64, tpu.core_type = #tpu.core_type<tc>, window_params = [{transform_indices = @transform_0, window_bounds = array<i64: 8, 128>}, {transform_indices = @transform_1, window_bounds = array<i64: 8, 128>}, {transform_indices = @transform_2, window_bounds = array<i64: 8, 128>}, {transform_indices = @transform_3, window_bounds = array<i64: 1, 8, 128>}, {transform_indices = @transform_4, window_bounds = array<i64: 1, 8, 128>}]} {
    %c0 = arith.constant 0 : index
    %c0_0 = arith.constant 0 : index
    %c0_1 = arith.constant 0 : index
    %0 = vector.load %arg5[%c0, %c0_0, %c0_1] : memref<1x8x128xf32, #tpu.memory_space<vmem>>, vector<1x8x128xf32>
    %1 = vector.shape_cast %0 : vector<1x8x128xf32> to vector<8x128xf32>
    %c127_i32 = arith.constant 127 : i32
    %2 = tpu.dynamic_rotate %1 by %c127_i32 dim 1 : vector<8x128xf32>, i32 -> vector<8x128xf32>
    %c1_i32 = arith.constant 1 : i32
    %3 = tpu.dynamic_rotate %1 by %c1_i32 dim 1 : vector<8x128xf32>, i32 -> vector<8x128xf32>
    %c0_2 = arith.constant 0 : index
    %c0_3 = arith.constant 0 : index
    %4 = vector.load %arg2[%c0_2, %c0_3] : memref<8x128xf32, #tpu.memory_space<vmem>>, vector<8x128xf32>
    %5 = arith.mulf %1, %4 : vector<8x128xf32>
    %c0_4 = arith.constant 0 : index
    %c0_5 = arith.constant 0 : index
    %6 = vector.load %arg3[%c0_4, %c0_5] : memref<8x128xf32, #tpu.memory_space<vmem>>, vector<8x128xf32>
    %7 = arith.mulf %2, %6 : vector<8x128xf32>
    %8 = arith.addf %5, %7 : vector<8x128xf32>
    %c0_6 = arith.constant 0 : index
    %c0_7 = arith.constant 0 : index
    %9 = vector.load %arg4[%c0_6, %c0_7] : memref<8x128xf32, #tpu.memory_space<vmem>>, vector<8x128xf32>
    %10 = arith.mulf %3, %9 : vector<8x128xf32>
    %11 = arith.addf %8, %10 : vector<8x128xf32>
    %c0_8 = arith.constant 0 : index
    %c0_9 = arith.constant 0 : index
    %c0_10 = arith.constant 0 : index
    %12 = vector.load %arg6[%c0_8, %c0_9, %c0_10] : memref<1x8x128xf32, #tpu.memory_space<vmem>>, vector<1x8x128xf32>
    %13 = vector.shape_cast %12 : vector<1x8x128xf32> to vector<8x128xf32>
    %14 = vector.shape_cast %11 : vector<8x128xf32> to vector<1x8x128xf32>
    tpu.vector_store %arg6[%c0_8, %c0_9, %c0_10], %14 {strides = array<i32>} : memref<1x8x128xf32, #tpu.memory_space<vmem>>, vector<1x8x128xf32>,
    return
  }
  func.func @transform_0(%arg0: i32, %arg1: i32) -> (i32, i32) {
    %c0_i32 = arith.constant 0 : i32
    %c0_i32_0 = arith.constant 0 : i32
    return %arg0, %c0_i32 : i32, i32
  }
  func.func @transform_1(%arg0: i32, %arg1: i32) -> (i32, i32) {
    %c0_i32 = arith.constant 0 : i32
    %c0_i32_0 = arith.constant 0 : i32
    return %arg0, %c0_i32 : i32, i32
  }
  func.func @transform_2(%arg0: i32, %arg1: i32) -> (i32, i32) {
    %c0_i32 = arith.constant 0 : i32
    %c0_i32_0 = arith.constant 0 : i32
    return %arg0, %c0_i32 : i32, i32
  }
  func.func @transform_3(%arg0: i32, %arg1: i32) -> (i32, i32, i32) {
    %c0_i32 = arith.constant 0 : i32
    %c0_i32_0 = arith.constant 0 : i32
    return %arg1, %arg0, %c0_i32 : i32, i32, i32
  }
  func.func @transform_4(%arg0: i32, %arg1: i32) -> (i32, i32, i32) {
    %c0_i32 = arith.constant 0 : i32
    %c0_i32_0 = arith.constant 0 : i32
    return %arg1, %arg0, %c0_i32 : i32, i32, i32
  }
}

</mosaic_0001>

<bundles_post_ra>
// kernel: tpu_custom_call.1
= control target key start
LH: loop header
LB: loop body
LE: loop exit
PB: predicated region body
PF: predicated region fallthrough
CT: control target
= control target key end

     0   :  { %9 = vsyncpa [#allocation3], 0  ;;  %s1071_s0 = inlined_call_operand.hbm [shape: f32[16,128], index: 0, kind: input, shape index: {}]   ;;  %s1072_s1 = inlined_call_operand.hbm [shape: f32[16,128], index: 1, kind: input, shape index: {}]   ;;  %s1073_s2 = inlined_call_operand.hbm [shape: f32[16,128], index: 2, kind: input, shape index: {}]   ;;  %s1074_s3 = inlined_call_operand.hbm [shape: f32[2,8,128], index: 3, kind: input, shape index: {}]   ;;  %s1075_s4 = inlined_call_operand.hbm [shape: f32[2,8,128], index: 4, kind: output, shape index: {}]  }
   0x1   :  { %10 = vsyncpa [#allocation6], 0 }
   0x2   :  { %11 = vsyncpa [#allocation9], 0 }
   0x3   :  { %13 = vsyncpa [#allocation9 + $0x1], 0 }
   0x4   :  { %14 = vsyncpa [#allocation4], 0 }
   0x5   :  { %16 = vsyncpa [#allocation4 + $0x1], 0  ;;  %s787_s15 = smov 0   ;;  %s789_s16 = smov 0  }
   0x6   :  { %s791_s17 = smov 0   ;;  %s793_s18 = smov 0  }
   0x7   :  { %s795_s19 = smov 0   ;;  %s797_s20 = smov 0  }
   0x8 LB: > { %s435_s21 = sadd.s32 4294967295, %s753_s20   ;;  %s436_s22 = sadd.s32 4294967294, %s753_s20   ;;  %s753_s20 = sphi %s797_s20, %s22_s20   ;;  %s749_s19 = sphi %s795_s19, %s1102_s19   ;;  %s745_s18 = sphi %s793_s18, %s1101_s18   ;;  %s741_s17 = sphi %s791_s17, %s1100_s17   ;;  %s737_s16 = sphi %s789_s16, %s1099_s16   ;;  %s733_s15 = sphi %s787_s15, %s1098_s15  }
   0x9   : > { %p134_p0 = scmp.ne.s32.totalorder %s737_s16, %s733_s15  ;;  %p821_p1 = scmp.eq.s32.totalorder %s435_s21, 0 }
   0xa   : > { %p825_p2 = scmp.eq.s32.totalorder %s435_s21, 1  ;;  %p166_p3 = scmp.eq.s32.totalorder %s436_s22, 1 }
   0xb   : > { %s1081_s23 = scalar_select %p821_p1, 1, 0 }
   0xc   : > { %s1082_s24 = scalar_select %p825_p2, 1, 0 }
   0xd   : > { %p831_p4 = por %p821_p1, %p134_p0  ;;  %p437_p5 = scmp.ge.s32.totalorder %s753_s20, 1 }
   0xe   : > { %p836_p6 = por %p166_p3, %p134_p0  ;;  %p173_p7 = scmp.lt.s32.totalorder %s753_s20, 3 }
   0xf   : > { %s1083_s25 = scalar_select %p831_p4, 1, 0 }
  0x10   : > { %s1084_s26 = scalar_select %p836_p6, 1, 0 }
  0x11   : > { %p841_p8 = pnand %p437_p5, %p173_p7  ;;  %s755_s28 = smov [#allocation5]  }
  0x12   : > { %1085 = sst [smem:[#allocation15_spill]] %s1084_s26  ;;  %s201_s29 = sshll.u32 %s755_s28, 4  ;;  %s845_s29 = int_to_ptr.vmem [resolvable:$true] %s201_s29 }
  0x13   : > { %s1086_s27 = scalar_select %p841_p8, 1, 0 }
  0x14   : > { %p470_p10 = pneg %p841_p8  ;;  %s756_s5 = smov [#allocation2]  }
  0x15   : > { %s188_s6 = sshll.u32 %s756_s5, 4  ;;  %s757_s7 = smov [#allocation7]   ;;  %s856_s6 = int_to_ptr.vmem [resolvable:$true] %s188_s6 }
  0x16   : > { %p852_p11 = pnand %p470_p10, %p821_p1  ;;  %s858_s8 = sshll.u32 %s757_s7, 4  ;;  %s215_s8 = int_to_ptr.vmem [resolvable:$true] %s858_s8 }
  0x17   : > { %s549_s11 = scalar_lea.hbm %s1072_s1, 128  ;;  %s554_s28 = scalar_lea.hbm %s1072_s1, 256 }
  0x18   : > { %p550_p12 = scmp.ne.s32.totalorder %s1072_s1, %s549_s11  ;;  %p868_p13 = pneg %p852_p11 }
  0x19   : > { %p555_p5 = scmp.lt.u32.totalorder %s554_s28, %s549_s11  ;;  %p556_p7 = scmp.lt.u32.totalorder %s549_s11, %s1072_s1 }
  0x1a   : > { %p552_p0 = pnand %p868_p13, %p550_p12 }
  0x1b   : > { %p557_p10 = por %p556_p7, %p555_p5 }
  0x1c   : > { %p553_p3 = pneg %p552_p0 }
  0x1e   : > { %p558_p9 = pnand %p557_p10, %p553_p3 }
  0x20   : > { %561 = shalt.err (!%p558_p9)
}
  0x21   : > { %s562_s9 = scalar_lea.vmem %s845_s29, 128  ;;  %p570_p4 = scmp.lt.s32.totalorder %s845_s29, %s845_s29 }
  0x22   : > { %p563_p6 = scmp.ne.s32.totalorder %s845_s29, %s562_s9  ;;  %p571_p1 = scmp.lt.s32.totalorder %s562_s9, %s562_s9 }
  0x24   : > { %p565_p12 = pnand %p563_p6, %p868_p13  ;;  %p572_p8 = por %p571_p1, %p570_p4 }
  0x26   : > { %p566_p0 = pneg %p565_p12 }
  0x28   : > { %p573_p2 = pnand %p572_p8, %p566_p0 }
  0x2a   : > { %576 = shalt.err (!%p573_p2)
}
  0x2b   : > { %476 = dma.hbm_to_vmem [thread:$0]  (!%p852_p11), %s1072_s1, 128, %s845_s29, [#allocation6]  }
  0x2c   : > { %s577_s21 = scalar_lea.hbm %s1071_s0, 128  ;;  %s582_s9 = scalar_lea.hbm %s1071_s0, 256 }
  0x2d   : > { %p578_p6 = scmp.ne.s32.totalorder %s1071_s0, %s577_s21  ;;  %p583_p2 = scmp.lt.u32.totalorder %s582_s9, %s577_s21 }
  0x2e   : > { %p584_p8 = scmp.lt.u32.totalorder %s577_s21, %s1071_s0 }
  0x2f   : > { %p580_p1 = pnand %p578_p6, %p868_p13 }
  0x30   : > { %p585_p9 = por %p584_p8, %p583_p2 }
  0x31   : > { %p581_p4 = pneg %p580_p1 }
  0x33   : > { %p586_p3 = pnand %p585_p9, %p581_p4 }
  0x35   : > { %589 = shalt.err (!%p586_p3)
}
  0x36   : > { %s590_s29 = scalar_lea.vmem %s856_s6, 128  ;;  %p598_p12 = scmp.lt.s32.totalorder %s856_s6, %s856_s6 }
  0x37   : > { %p591_p5 = scmp.ne.s32.totalorder %s856_s6, %s590_s29  ;;  %p599_p0 = scmp.lt.s32.totalorder %s590_s29, %s590_s29 }
  0x39   : > { %p593_p7 = pnand %p591_p5, %p868_p13  ;;  %p600_p6 = por %p599_p0, %p598_p12 }
  0x3b   : > { %p594_p10 = pneg %p593_p7 }
  0x3d   : > { %p601_p1 = pnand %p600_p6, %p594_p10 }
  0x3f   : > { %604 = shalt.err (!%p601_p1)
}
  0x40   : > { %473 = dma.hbm_to_vmem [thread:$0]  (!%p852_p11), %s1071_s0, 128, %s856_s6, [#allocation3]  }
  0x41   : > { %s605_s21 = scalar_lea.hbm %s1073_s2, 128  ;;  %s610_s9 = scalar_lea.hbm %s1073_s2, 256 }
  0x42   : > { %p606_p4 = scmp.ne.s32.totalorder %s1073_s2, %s605_s21  ;;  %p611_p9 = scmp.lt.u32.totalorder %s610_s9, %s605_s21 }
  0x43   : > { %p612_p3 = scmp.lt.u32.totalorder %s605_s21, %s1073_s2 }
  0x44   : > { %p608_p2 = pnand %p606_p4, %p868_p13 }
  0x45   : > { %p613_p5 = por %p612_p3, %p611_p9 }
  0x46   : > { %p609_p8 = pneg %p608_p2 }
  0x48   : > { %p614_p7 = pnand %p613_p5, %p609_p8 }
  0x4a   : > { %617 = shalt.err (!%p614_p7)
}
  0x4b   : > { %s618_s6 = scalar_lea.vmem %s215_s8, 128  ;;  %p626_p6 = scmp.lt.s32.totalorder %s215_s8, %s215_s8 }
  0x4c   : > { %p619_p10 = scmp.ne.s32.totalorder %s215_s8, %s618_s6  ;;  %p627_p1 = scmp.lt.s32.totalorder %s618_s6, %s618_s6 }
  0x4e   : > { %p621_p12 = pnand %p619_p10, %p868_p13  ;;  %p628_p4 = por %p627_p1, %p626_p6 }
  0x50   : > { %p622_p0 = pneg %p621_p12 }
  0x52   : > { %p629_p2 = pnand %p628_p4, %p622_p0 }
  0x54   : > { %632 = shalt.err (!%p629_p2)
}
  0x55   : > { %479 = dma.hbm_to_vmem [thread:$0]  (!%p852_p11), %s1073_s2, 128, %s215_s8, [#allocation6]  }
  0x56   : > { %s121_s14 = sadd.s32 1, %s741_s17  ;;  %s31_s12 = sadd.s32 1, %s749_s19 }
  0x57   : > { %p128_p13 = scmp.ne.s32.totalorder %s741_s17, %s737_s16  ;;  %p32_p8 = scmp.ge.s32.totalorder %s31_s12, 2 }
  0x58   : > { %p129_p9 = scmp.eq.s32.totalorder %s753_s20, 0  ;;  %p1089_p3 = scmp.ne.s32.totalorder %s1082_s24, 0 }
  0x59   : > { %p491_p7 = scmp.lt.s32.totalorder %s753_s20, 2  ;;  %s1104_s12 = smov (%p32_p8, %s31_s12), 0 }
  0x5a   : > { %p947_p5 = por %p1089_p3, %p128_p13  ;;  %p130_p10 = por %p129_p9, %p128_p13 }
  0x5b   : > { %s225_s13 = sand.u32 1, %s741_s17   ;;  %s116_s21 = ssub.s32 %s749_s19, %s1104_s12 }
  0x5c   : > { %p119_p12 = scmp.eq.s32.totalorder %s116_s21, 0  ;;  %s442_s8 = sshll.u32 %s225_s13, 3 }
  0x5d   : > { %s443_s22 = sshll.u32 %s749_s19, 7  ;;  %s229_s9 = scalar_lea.vmem [#allocation8], %s442_s8 }
  0x5e   : > { %s959_s28 = scalar_select %p119_p12, %s741_s17, %s121_s14  }
  0x5f   : > { %s964_s24 = scalar_lea.hbm %s1074_s3, %s443_s22  ;;  %s237_s10 = sshll.u32 %s229_s9, 4  ;;  %s966_s10 = int_to_ptr.vmem [resolvable:$true] %s237_s10 }
  0x60   : > { %p970_p11 = pnand %p491_p7, %p130_p10  ;;  %s226_s6 = scalar_lea.sflag [#allocation9], %s225_s13 }
  0x61   : > { %s633_s26 = scalar_lea.hbm %s964_s24, 128  ;;  %s638_s21 = scalar_lea.hbm %s1074_s3, 256 }
  0x62   : > { %p634_p0 = scmp.ne.s32.totalorder %s964_s24, %s633_s26  ;;  %p635_p6 = pneg %p970_p11 }
  0x63   : > { %p639_p2 = scmp.lt.u32.totalorder %s964_s24, %s1074_s3  ;;  %p640_p13 = scmp.lt.u32.totalorder %s638_s21, %s633_s26 }
  0x64   : > { %p636_p1 = pnand %p635_p6, %p634_p0  ;;  %p642_p9 = scmp.lt.u32.totalorder %s633_s26, %s964_s24 }
  0x65   : > { %p641_p8 = por %p640_p13, %p639_p2 }
  0x66   : > { %p637_p4 = pneg %p636_p1 }
  0x67   : > { %p643_p3 = por %p642_p9, %p641_p8 }
  0x69   : > { %p644_p7 = pnand %p643_p3, %p637_p4 }
  0x6b   : > { %647 = shalt.err (!%p644_p7)
}
  0x6c   : > { %s648_s13 = scalar_lea.vmem %s966_s10, 128  ;;  %s758_s5 = smov [#allocation8]  }
  0x6d   : > { %p649_p10 = scmp.ne.s32.totalorder %s966_s10, %s648_s13  ;;  %s653_s7 = sshll.u32 %s758_s5, 4  ;;  %s654_s7 = int_to_ptr.vmem [resolvable:$false] %s653_s7 }
  0x6e   : > { %s655_s9 = scalar_lea.vmem %s654_s7, 256  ;;  %p656_p1 = scmp.lt.s32.totalorder %s966_s10, %s654_s7 }
  0x6f   : > { %p651_p12 = pnand %p649_p10, %p635_p6  ;;  %p657_p2 = scmp.lt.s32.totalorder %s655_s9, %s648_s13 }
  0x71   : > { %p652_p0 = pneg %p651_p12  ;;  %p658_p13 = por %p657_p2, %p656_p1 }
  0x73   : > { %p659_p8 = pnand %p658_p13, %p652_p0 }
  0x75   : > { %662 = shalt.err (!%p659_p8)
}
  0x76   : > { %483 = dma.hbm_to_vmem [thread:$0]  (!%p970_p11), %s964_s24, 128, %s966_s10, %s226_s6  }
  0x77   : > { %p1092_p4 = scmp.ne.s32.totalorder %s1086_s27, 0 }
  0x78   : > { %p1093_p6 = scmp.ne.s32.totalorder (!%p1092_p4), %s1081_s23, 0 }
  0x79   : > { %246 = sbr.rel (%p1092_p4) target bundleno = 273 (0x111), region = 36 }
  0x80   : > { %716 = dma.done.wait (%p1093_p6), [#allocation3], 128  }
  0x81   : > { %718 = vsyncadd (%p1093_p6), [#allocation3], 4294967168 }
  0x82   : > { %720 = dma.done.wait (%p1093_p6), [#allocation6], 256  }
  0x83   : > { %722 = vsyncadd (%p1093_p6), [#allocation6], 4294967040  ;;  %s1010_s29 = sand.u32 1, %s737_s16   ;;  %p1094_p11 = scmp.ne.s32.totalorder %s1083_s25, 0 }
  0x84   : > { %s448_s27 = sshll.u32 %s1010_s29, 3  ;;  %s261_s24 = scalar_lea.sflag [#allocation9], %s1010_s29 }
  0x85   : > { %s264_s10 = scalar_lea.vmem [#allocation8], %s448_s27 }
  0x86   : > { %724 = dma.done.wait (%p1094_p11), %s261_s24, 128  }
  0x87   : > { %726 = vsyncadd (%p1094_p11), %s261_s24, 4294967168  ;;  %v289_v0 = vld [vmem:[%s264_s10] sm:$0xff]  ;;  %s759_s6 = smov 127   ;;  %s760_s23 = smov 1   ;;  %v296_v2 = vld [vmem:[#allocation5] sm:$0xff] }
  0x88   : > { %290 = vrot.lane.b32.xlu0 %v289_v0, %s759_s6  ;;  %v294_v1 = vld [vmem:[#allocation2] sm:$0xff]  ;;  %v299_v6 = vld [vmem:[#allocation7] sm:$0xff]  ;;  %s451_s26 = sshll.u32 %s745_s18, 7  ;;  %s288_s11 = scalar_lea.vmem [#allocation10], %s448_s27 }
  0x89   : > { %v295_v4 = vmul.f32 %v294_v1, %v289_v0  ;;  %s318_s14 = sshll.u32 %s288_s11, 4  ;;  %s1022_s8 = scalar_lea.hbm %s1075_s4, %s451_s26  ;;  %s1024_s14 = int_to_ptr.vmem [resolvable:$true] %s318_s14 }
  0x8a   : > { %s304_s22 = scalar_lea.sflag [#allocation4], %s1010_s29  ;;  %s663_s13 = scalar_lea.vmem %s1024_s14, 128 }
  0x8b   : > { %p664_p9 = scmp.ne.s32.totalorder %s1024_s14, %s663_s13  ;;  %s761_s18 = smov [#allocation10]  }
  0x8c   : > { %292 = vrot.lane.b32.xlu0 %v289_v0, %s760_s23  ;;  %s667_s5 = sshll.u32 %s761_s18, 4  ;;  %s668_s5 = int_to_ptr.vmem [resolvable:$false] %s667_s5 }
  0x8d   : > { %p665_p3 = pnand %p664_p9, %p947_p5  ;;  %s669_s7 = scalar_lea.vmem %s668_s5, 256 }
  0x8e   : > { %p670_p10 = scmp.lt.s32.totalorder %s1024_s14, %s668_s5  ;;  %p671_p12 = scmp.lt.s32.totalorder %s669_s7, %s663_s13 }
  0x8f   : > { %p666_p7 = pneg %p665_p3 }
  0x90   : > { %p672_p0 = por %p671_p12, %p670_p10 }
  0x92   : > { %p673_p1 = pnand %p672_p0, %p666_p7 }
  0xfa   : > { %v291_v3 = vpop.permute.xlu0 %290 }
  0xfb   : > { %v297_v5 = vmul.f32 %v296_v2, %v291_v3 }
  0xfd   : > { %v298_v8 = vadd.f32 %v297_v5, %v295_v4 }
  0xfe   : > { %v293_v7 = vpop.permute.xlu0 %292 }
  0xff   : > { %v300_v9 = vmul.f32 %v299_v6, %v293_v7 }
 0x101   : > { %v301_v10 = vadd.f32 %v300_v9, %v298_v8 }
 0x103   : > { %302 = vst [vmem:[%s288_s11] sm:$0xff] %v301_v10 }
 0x104   : > { %676 = shalt.err (!%p673_p1)
}
 0x105   : > { %s677_s9 = scalar_lea.hbm %s1022_s8, 128  ;;  %s681_s24 = scalar_lea.hbm %s1075_s4, 256 }
 0x106   : > { %p678_p2 = scmp.ne.s32.totalorder %s1022_s8, %s677_s9  ;;  %p682_p4 = scmp.lt.u32.totalorder %s1022_s8, %s1075_s4 }
 0x107   : > { %p683_p6 = scmp.lt.u32.totalorder %s681_s24, %s677_s9  ;;  %p685_p9 = scmp.lt.u32.totalorder %s677_s9, %s1022_s8 }
 0x108   : > { %p679_p13 = pnand %p678_p2, %p947_p5 }
 0x109   : > { %p684_p11 = por %p683_p6, %p682_p4 }
 0x10a   : > { %p680_p8 = pneg %p679_p13 }
 0x10b   : > { %p686_p3 = por %p685_p9, %p684_p11 }
 0x10d   : > { %p687_p7 = pnand %p686_p3, %p680_p8 }
 0x10f   : > { %690 = shalt.err (!%p687_p7)
}
 0x110   : > { %468 = dma.vmem_to_hbm [thread:$0]  (%p947_p5), %s1024_s14, 128, %s1022_s8, %s304_s22  }
 0x111 PF: > { %s1095_s23 = sld [smem:[#allocation15_spill]]  ;;  %s330_s26 = sand.u32 1, %s733_s15  }
 0x112   : > { %p1097_p12 = scmp.ge.s32.totalorder %s753_s20, 2  ;;  %s331_s11 = scalar_lea.sflag [#allocation4], %s330_s26 }
 0x117   : > { %p1096_p10 = scmp.ne.s32.totalorder %s1095_s23, 0 }
 0x119   : > { %p485_p0 = pnand %p1097_p12, %p1096_p10 }
 0x11b   : > { %728 = dma.done.wait (!%p485_p0), %s331_s11, 128  }
 0x11c   : > { %730 = vsyncadd (!%p485_p0), %s331_s11, 4294967168  ;;  %s22_s20 = sadd.s32 1, %s753_s20   ;;  %s1098_s15 = smov %s737_s16 }
 0x11d   : > { %p19_p1 = scmp.ge.s32.totalorder %s22_s20, 4   ;;  %s1099_s16 = smov %s741_s17 }
 0x11e   : > { %s1100_s17 = smov %s959_s28  ;;  %s1101_s18 = smov %s749_s19 }
 0x11f   : > { %s1102_s19 = smov %s1104_s12  ;;  %21 = sbr.rel (!%p19_p1) target bundleno = 8 (0x8), region = 97 }
 0x126   :  { %336 = vsyncpa [#allocation3], 1 }
 0x127   :  { %338 = vsyncpa [#allocation3 + $0x1], 1 }
 0x128   :  { %339 = vsyncpa [#allocation6], 1 }
 0x129   :  { %340 = vsyncpa [#allocation9], 1 }
 0x12a   :  { %342 = vsyncpa [#allocation9 + $0x1], 1 }
 0x12b   :  { %343 = vsyncpa [#allocation4], 1 }
 0x12c   :  { %345 = vsyncpa [#allocation4 + $0x1], 1 }

</bundles_post_ra>
